<compile_context>
chip_gen: v5e
topology: v5e:2x2
jax: 0.10.0
libtpu: 0.0.40
codegen_flags: <defaults>
</compile_context>

<pallas_src>
import math

import jax
import jax.numpy as jnp
from jax.experimental import pallas as pl
from jax.experimental.pallas import tpu as pltpu

NEG_SLOPE = 0.01   # PyTorch nn.LeakyReLU default
LANE = 128         # TPU lane width


def _leaky(t):
    return jnp.where(t > 0, t, NEG_SLOPE * t)


def _round_up(x, m):
    return (x + m - 1) // m * m


# ----------------------------------------------------------------------------
# Kernel: one batch tile (TB rows), all weights resident in VMEM.
# ----------------------------------------------------------------------------
def rsr_ae_kernel(x_ref,
                  w1_ref, b1_ref, w2_ref, b2_ref, w3_ref, b3_ref,   # encoder
                  at_ref,                                            # A^T (D_p, d_p)
                  w4_ref, b4_ref, w5_ref, b5_ref, w6_ref, b6_ref,    # decoder
                  enc_ref, dec_ref, lat_ref):
    f32 = jnp.float32
    x = x_ref[...]
    cdt = x.dtype  # MXU operand dtype (bf16 by default)

    # encoder: Linear -> LeakyReLU -> Linear -> LeakyReLU -> Linear
    h = jnp.dot(x, w1_ref[...], preferred_element_type=f32) + b1_ref[...]
    h = _leaky(h).astype(cdt)
    h = jnp.dot(h, w2_ref[...], preferred_element_type=f32) + b2_ref[...]
    h = _leaky(h).astype(cdt)
    enc = jnp.dot(h, w3_ref[...], preferred_element_type=f32) + b3_ref[...]
    enc_ref[...] = enc.astype(enc_ref.dtype)

    # RSR layer: latent[b] = A @ enc[b]  ==  enc @ A^T
    lat = jnp.dot(enc.astype(cdt), at_ref[...], preferred_element_type=f32)
    lat_ref[...] = lat.astype(lat_ref.dtype)

    # decoder: Linear -> LeakyReLU -> Linear -> LeakyReLU -> Linear
    g = jnp.dot(lat.astype(cdt), w4_ref[...], preferred_element_type=f32) + b4_ref[...]
    g = _leaky(g).astype(cdt)
    g = jnp.dot(g, w5_ref[...], preferred_element_type=f32) + b5_ref[...]
    g = _leaky(g).astype(cdt)
    dec = jnp.dot(g, w6_ref[...], preferred_element_type=f32) + b6_ref[...]
    dec_ref[...] = dec.astype(dec_ref.dtype)


# ----------------------------------------------------------------------------
# Parameter construction (synthetic, deterministic). Linear weights are (in, out).
# ----------------------------------------------------------------------------
def make_params(key, input_dim, d, D, dtype=jnp.float32):
    h1, h2 = input_dim // 2, input_dim // 4
    keys = jax.random.split(key, 13)

    def lin(kw, kb, fan_in, fan_out):
        scale = 1.0 / math.sqrt(fan_in)
        w = jax.random.uniform(kw, (fan_in, fan_out), dtype, -scale, scale)
        b = jax.random.uniform(kb, (1, fan_out), dtype, -scale, scale)
        return w, b

    w1, b1 = lin(keys[0], keys[1], input_dim, h1)
    w2, b2 = lin(keys[2], keys[3], h1, h2)
    w3, b3 = lin(keys[4], keys[5], h2, D)
    A = jax.nn.initializers.orthogonal()(keys[6], (d, D), dtype)
    w4, b4 = lin(keys[7], keys[8], d, D)
    w5, b5 = lin(keys[9], keys[10], D, h1)
    w6, b6 = lin(keys[11], keys[12], h1, input_dim)
    return {"w1": w1, "b1": b1, "w2": w2, "b2": b2, "w3": w3, "b3": b3,
            "A": A, "w4": w4, "b4": b4, "w5": w5, "b5": b5, "w6": w6, "b6": b6}


# ----------------------------------------------------------------------------
# One-time layout prep: pad feature dims to multiples of 128 (lane-dense),
# cast MXU operands to bf16, pre-transpose A. Padded entries are exactly zero,
# so results in the original columns are unchanged.
# ----------------------------------------------------------------------------
def prepare_kernel_params(params, compute_dtype=jnp.bfloat16):
    d, D = params["A"].shape
    input_dim = params["w1"].shape[0]
    h1, h2 = input_dim // 2, input_dim // 4
    IN_p, H1_p, H2_p = (_round_up(v, LANE) for v in (input_dim, h1, h2))
    D_p, d_p = _round_up(D, LANE), _round_up(d, LANE)

    def padw(w, r, c):   # MXU operand: pad + cast
        return jnp.pad(w, ((0, r - w.shape[0]), (0, c - w.shape[1]))).astype(compute_dtype)

    def padb(b, c):      # bias: pad, keep f32
        return jnp.pad(b, ((0, 0), (0, c - b.shape[1]))).astype(jnp.float32)

    prepared = {
        "w1": padw(params["w1"], IN_p, H1_p), "b1": padb(params["b1"], H1_p),
        "w2": padw(params["w2"], H1_p, H2_p), "b2": padb(params["b2"], H2_p),
        "w3": padw(params["w3"], H2_p, D_p),  "b3": padb(params["b3"], D_p),
        "at": padw(params["A"].T, D_p, d_p),
        "w4": padw(params["w4"], d_p, D_p),   "b4": padb(params["b4"], D_p),
        "w5": padw(params["w5"], D_p, H1_p),  "b5": padb(params["b5"], H1_p),
        "w6": padw(params["w6"], H1_p, IN_p), "b6": padb(params["b6"], IN_p),
    }
    meta = {"dims": (input_dim, d, D),
            "padded": (IN_p, H1_p, H2_p, D_p, d_p),
            "compute_dtype": compute_dtype,
            "A": params["A"]}
    return prepared, meta


_W_ORDER = ["w1", "b1", "w2", "b2", "w3", "b3", "at",
            "w4", "b4", "w5", "b5", "w6", "b6"]


# ----------------------------------------------------------------------------
# Forward wrapper.
# ----------------------------------------------------------------------------
def rsr_autoencoder_forward(x, prepared, meta, *, tb=256):
    B, input_dim = x.shape
    input_dim_m, d, D = meta["dims"]
    assert input_dim == input_dim_m
    IN_p, H1_p, H2_p, D_p, d_p = meta["padded"]
    cdt = meta["compute_dtype"]
    out_dtype = x.dtype

    # Batch tile: fill the MXU M dimension for real batches (tb=256 default;
    # pass tb=128 on v5e), clamped to the batch. Multiple of 16 for bf16 packing.
    TB = min(tb, _round_up(B, 16))
    B_p = _round_up(B, TB)                 # pad rows so every tile is full
    grid = (pl.cdiv(B_p, TB),)

    x_p = jnp.pad(x, ((0, B_p - B), (0, IN_p - input_dim))).astype(cdt)

    def tile_spec(feat):
        return pl.BlockSpec((TB, feat), lambda i: (i, 0))

    def full_spec(shape):
        return pl.BlockSpec(shape, lambda i: (0, 0))

    weight_args = [prepared[k] for k in _W_ORDER]
    in_specs = [tile_spec(IN_p)] + [full_spec(prepared[k].shape) for k in _W_ORDER]
    out_specs = (tile_spec(D_p), tile_spec(IN_p), tile_spec(d_p))
    out_shape = (
        jax.ShapeDtypeStruct((B_p, D_p), out_dtype),   # enc  (padded)
        jax.ShapeDtypeStruct((B_p, IN_p), out_dtype),  # dec  (padded)
        jax.ShapeDtypeStruct((B_p, d_p), out_dtype),   # lat  (padded)
    )

    # VMEM budget (conservatively assume double-buffering of every block) and
    # a cost estimate so XLA can schedule around the call.
    def nbytes(shape, dt):
        return math.prod(shape) * jnp.dtype(dt).itemsize

    weight_bytes = sum(nbytes(prepared[k].shape, prepared[k].dtype) for k in _W_ORDER)
    block_bytes = (nbytes((TB, IN_p), cdt) + weight_bytes
                   + nbytes((TB, D_p), out_dtype)
                   + nbytes((TB, IN_p), out_dtype)
                   + nbytes((TB, d_p), out_dtype))
    vmem_limit = int(min(max(2 * block_bytes + (2 << 20), 8 << 20), 120 << 20))

    flops = 2 * B_p * (IN_p * H1_p + H1_p * H2_p + H2_p * D_p
                       + D_p * d_p + d_p * D_p + D_p * H1_p + H1_p * IN_p)
    bytes_accessed = (nbytes((B_p, IN_p), cdt) + weight_bytes
                      + nbytes((B_p, D_p), out_dtype)
                      + nbytes((B_p, IN_p), out_dtype)
                      + nbytes((B_p, d_p), out_dtype))

    enc_p, dec_p, lat_p = pl.pallas_call(
        rsr_ae_kernel,
        grid=grid,
        in_specs=in_specs,
        out_specs=out_specs,
        out_shape=out_shape,
        compiler_params=pltpu.CompilerParams(
            dimension_semantics=("parallel",),
            vmem_limit_bytes=vmem_limit,
        ),
        cost_estimate=pl.CostEstimate(
            flops=flops, transcendentals=0, bytes_accessed=bytes_accessed),
    )(x_p, *weight_args)

    enc = enc_p[:B, :D]
    dec = dec_p[:B, :input_dim]
    lat = lat_p[:B, :d]
    # Matches PyTorch: return (enc, dec, latent, self.rsr.A)
    return enc, dec, lat, meta["A"]


# ----------------------------------------------------------------------------
# Pure-JAX f32 reference.
# ----------------------------------------------------------------------------
def reference_forward(x, params):
    lk = lambda t: jnp.where(t > 0, t, NEG_SLOPE * t)
    h = lk(x @ params["w1"] + params["b1"])
    h = lk(h @ params["w2"] + params["b2"])
    enc = h @ params["w3"] + params["b3"]
    lat = enc @ params["A"].T
    g = lk(lat @ params["w4"] + params["b4"])
    g = lk(g @ params["w5"] + params["b5"])
    dec = g @ params["w6"] + params["b6"]
    return enc, dec, lat, params["A"]


if __name__ == "__main__":
    B, input_dim, d, D = 8, 64, 8, 16

    key = jax.random.PRNGKey(0)
    kx, kp = jax.random.split(key)
    x = jax.random.normal(kx, (B, input_dim), jnp.float32)
    params = make_params(kp, input_dim, d, D)

    prepared, meta = prepare_kernel_params(params, compute_dtype=jnp.bfloat16)

    enc, dec, lat, A = rsr_autoencoder_forward(x, prepared, meta)
    jax.block_until_ready((enc, dec, lat, A))

    assert enc.shape == (B, D) and lat.shape == (B, d) and dec.shape == (B, input_dim)
    assert A.shape == (d, D)

    # bf16 MXU operands (f32 accumulation) -> loosened tolerances vs f32 reference.
    enc_r, dec_r, lat_r, _ = reference_forward(x, params)
    assert jnp.allclose(enc, enc_r, atol=3e-2, rtol=3e-2), float(jnp.max(jnp.abs(enc - enc_r)))
    assert jnp.allclose(lat, lat_r, atol=3e-2, rtol=3e-2), float(jnp.max(jnp.abs(lat - lat_r)))
    assert jnp.allclose(dec, dec_r, atol=3e-2, rtol=3e-2), float(jnp.max(jnp.abs(dec - dec_r)))

    print("KERNEL_OK")
</pallas_src>

<mosaic_0001>
module attributes {stable_mosaic.version = 11 : i64} {
  func.func @rsr_ae_kernel(%arg0: i32, %arg1: memref<16x128xbf16, #tpu.memory_space<vmem>>, %arg2: memref<128x128xbf16, #tpu.memory_space<vmem>>, %arg3: memref<1x128xf32, #tpu.memory_space<vmem>>, %arg4: memref<128x128xbf16, #tpu.memory_space<vmem>>, %arg5: memref<1x128xf32, #tpu.memory_space<vmem>>, %arg6: memref<128x128xbf16, #tpu.memory_space<vmem>>, %arg7: memref<1x128xf32, #tpu.memory_space<vmem>>, %arg8: memref<128x128xbf16, #tpu.memory_space<vmem>>, %arg9: memref<128x128xbf16, #tpu.memory_space<vmem>>, %arg10: memref<1x128xf32, #tpu.memory_space<vmem>>, %arg11: memref<128x128xbf16, #tpu.memory_space<vmem>>, %arg12: memref<1x128xf32, #tpu.memory_space<vmem>>, %arg13: memref<128x128xbf16, #tpu.memory_space<vmem>>, %arg14: memref<1x128xf32, #tpu.memory_space<vmem>>, %arg15: memref<16x128xf32, #tpu.memory_space<vmem>>, %arg16: memref<16x128xf32, #tpu.memory_space<vmem>>, %arg17: memref<16x128xf32, #tpu.memory_space<vmem>>) attributes {dimension_semantics = [#tpu.dimension_semantics<parallel>], iteration_bounds = array<i64: 1>, scalar_prefetch = 0 : i64, scratch_operands = 0 : i64, tpu.core_type = #tpu.core_type<tc>, window_params = [{transform_indices = @transform_0, window_bounds = array<i64: 16, 128>}, {pipeline_mode = #tpu.pipeline_mode<synchronous>, transform_indices = @transform_1, window_bounds = array<i64: 128, 128>}, {pipeline_mode = #tpu.pipeline_mode<synchronous>, transform_indices = @transform_2, window_bounds = array<i64: 1, 128>}, {pipeline_mode = #tpu.pipeline_mode<synchronous>, transform_indices = @transform_3, window_bounds = array<i64: 128, 128>}, {pipeline_mode = #tpu.pipeline_mode<synchronous>, transform_indices = @transform_4, window_bounds = array<i64: 1, 128>}, {pipeline_mode = #tpu.pipeline_mode<synchronous>, transform_indices = @transform_5, window_bounds = array<i64: 128, 128>}, {pipeline_mode = #tpu.pipeline_mode<synchronous>, transform_indices = @transform_6, window_bounds = array<i64: 1, 128>}, {pipeline_mode = #tpu.pipeline_mode<synchronous>, transform_indices = @transform_7, window_bounds = array<i64: 128, 128>}, {pipeline_mode = #tpu.pipeline_mode<synchronous>, transform_indices = @transform_8, window_bounds = array<i64: 128, 128>}, {pipeline_mode = #tpu.pipeline_mode<synchronous>, transform_indices = @transform_9, window_bounds = array<i64: 1, 128>}, {pipeline_mode = #tpu.pipeline_mode<synchronous>, transform_indices = @transform_10, window_bounds = array<i64: 128, 128>}, {pipeline_mode = #tpu.pipeline_mode<synchronous>, transform_indices = @transform_11, window_bounds = array<i64: 1, 128>}, {pipeline_mode = #tpu.pipeline_mode<synchronous>, transform_indices = @transform_12, window_bounds = array<i64: 128, 128>}, {pipeline_mode = #tpu.pipeline_mode<synchronous>, transform_indices = @transform_13, window_bounds = array<i64: 1, 128>}, {transform_indices = @transform_14, window_bounds = array<i64: 16, 128>}, {transform_indices = @transform_15, window_bounds = array<i64: 16, 128>}, {transform_indices = @transform_16, window_bounds = array<i64: 16, 128>}]} {
    %c0 = arith.constant 0 : index
    %c0_0 = arith.constant 0 : index
    %0 = vector.load %arg1[%c0, %c0_0] : memref<16x128xbf16, #tpu.memory_space<vmem>>, vector<16x128xbf16>
    %c0_1 = arith.constant 0 : index
    %c0_2 = arith.constant 0 : index
    %1 = vector.load %arg2[%c0_1, %c0_2] : memref<128x128xbf16, #tpu.memory_space<vmem>>, vector<128x128xbf16>
    %cst = arith.constant dense<0.000000e+00> : vector<16x128xf32>
    %2 = tpu.matmul %0, %1, %cst {dimension_numbers = #tpu.dot_dimension_numbers<[1], [0], [0], [1], [0, 0, 1, 1], [], []>} : vector<16x128xbf16>, vector<128x128xbf16>, vector<16x128xf32> -> vector<16x128xf32>
    %c0_3 = arith.constant 0 : index
    %c0_4 = arith.constant 0 : index
    %3 = vector.load %arg3[%c0_3, %c0_4] : memref<1x128xf32, #tpu.memory_space<vmem>>, vector<1x128xf32>
    %4 = vector.broadcast %3 : vector<1x128xf32> to vector<16x128xf32>
    %5 = arith.addf %2, %4 : vector<16x128xf32>
    %cst_5 = arith.constant 0.000000e+00 : f32
    %6 = vector.broadcast %cst_5 : f32 to vector<16x128xf32>
    %7 = arith.cmpf ogt, %5, %6 : vector<16x128xf32>
    %cst_6 = arith.constant 0.00999999977 : f32
    %8 = vector.broadcast %cst_6 : f32 to vector<16x128xf32>
    %9 = arith.mulf %8, %5 : vector<16x128xf32>
    %10 = arith.select %7, %5, %9 : vector<16x128xi1>, vector<16x128xf32>
    %11 = arith.truncf %10 : vector<16x128xf32> to vector<16x128xbf16>
    %c0_7 = arith.constant 0 : index
    %c0_8 = arith.constant 0 : index
    %12 = vector.load %arg4[%c0_7, %c0_8] : memref<128x128xbf16, #tpu.memory_space<vmem>>, vector<128x128xbf16>
    %cst_9 = arith.constant dense<0.000000e+00> : vector<16x128xf32>
    %13 = tpu.matmul %11, %12, %cst_9 {dimension_numbers = #tpu.dot_dimension_numbers<[1], [0], [0], [1], [0, 0, 1, 1], [], []>} : vector<16x128xbf16>, vector<128x128xbf16>, vector<16x128xf32> -> vector<16x128xf32>
    %c0_10 = arith.constant 0 : index
    %c0_11 = arith.constant 0 : index
    %14 = vector.load %arg5[%c0_10, %c0_11] : memref<1x128xf32, #tpu.memory_space<vmem>>, vector<1x128xf32>
    %15 = vector.broadcast %14 : vector<1x128xf32> to vector<16x128xf32>
    %16 = arith.addf %13, %15 : vector<16x128xf32>
    %cst_12 = arith.constant 0.000000e+00 : f32
    %17 = vector.broadcast %cst_12 : f32 to vector<16x128xf32>
    %18 = arith.cmpf ogt, %16, %17 : vector<16x128xf32>
    %cst_13 = arith.constant 0.00999999977 : f32
    %19 = vector.broadcast %cst_13 : f32 to vector<16x128xf32>
    %20 = arith.mulf %19, %16 : vector<16x128xf32>
    %21 = arith.select %18, %16, %20 : vector<16x128xi1>, vector<16x128xf32>
    %22 = arith.truncf %21 : vector<16x128xf32> to vector<16x128xbf16>
    %c0_14 = arith.constant 0 : index
    %c0_15 = arith.constant 0 : index
    %23 = vector.load %arg6[%c0_14, %c0_15] : memref<128x128xbf16, #tpu.memory_space<vmem>>, vector<128x128xbf16>
    %cst_16 = arith.constant dense<0.000000e+00> : vector<16x128xf32>
    %24 = tpu.matmul %22, %23, %cst_16 {dimension_numbers = #tpu.dot_dimension_numbers<[1], [0], [0], [1], [0, 0, 1, 1], [], []>} : vector<16x128xbf16>, vector<128x128xbf16>, vector<16x128xf32> -> vector<16x128xf32>
    %c0_17 = arith.constant 0 : index
    %c0_18 = arith.constant 0 : index
    %25 = vector.load %arg7[%c0_17, %c0_18] : memref<1x128xf32, #tpu.memory_space<vmem>>, vector<1x128xf32>
    %26 = vector.broadcast %25 : vector<1x128xf32> to vector<16x128xf32>
    %27 = arith.addf %24, %26 : vector<16x128xf32>
    %c0_19 = arith.constant 0 : index
    %c0_20 = arith.constant 0 : index
    %28 = vector.load %arg15[%c0_19, %c0_20] : memref<16x128xf32, #tpu.memory_space<vmem>>, vector<16x128xf32>
    tpu.vector_store %arg15[%c0_19, %c0_20], %27 {strides = array<i32>} : memref<16x128xf32, #tpu.memory_space<vmem>>, vector<16x128xf32>,
    %29 = arith.truncf %27 : vector<16x128xf32> to vector<16x128xbf16>
    %c0_21 = arith.constant 0 : index
    %c0_22 = arith.constant 0 : index
    %30 = vector.load %arg8[%c0_21, %c0_22] : memref<128x128xbf16, #tpu.memory_space<vmem>>, vector<128x128xbf16>
    %cst_23 = arith.constant dense<0.000000e+00> : vector<16x128xf32>
    %31 = tpu.matmul %29, %30, %cst_23 {dimension_numbers = #tpu.dot_dimension_numbers<[1], [0], [0], [1], [0, 0, 1, 1], [], []>} : vector<16x128xbf16>, vector<128x128xbf16>, vector<16x128xf32> -> vector<16x128xf32>
    %c0_24 = arith.constant 0 : index
    %c0_25 = arith.constant 0 : index
    %32 = vector.load %arg17[%c0_24, %c0_25] : memref<16x128xf32, #tpu.memory_space<vmem>>, vector<16x128xf32>
    tpu.vector_store %arg17[%c0_24, %c0_25], %31 {strides = array<i32>} : memref<16x128xf32, #tpu.memory_space<vmem>>, vector<16x128xf32>,
    %33 = arith.truncf %31 : vector<16x128xf32> to vector<16x128xbf16>
    %c0_26 = arith.constant 0 : index
    %c0_27 = arith.constant 0 : index
    %34 = vector.load %arg9[%c0_26, %c0_27] : memref<128x128xbf16, #tpu.memory_space<vmem>>, vector<128x128xbf16>
    %cst_28 = arith.constant dense<0.000000e+00> : vector<16x128xf32>
    %35 = tpu.matmul %33, %34, %cst_28 {dimension_numbers = #tpu.dot_dimension_numbers<[1], [0], [0], [1], [0, 0, 1, 1], [], []>} : vector<16x128xbf16>, vector<128x128xbf16>, vector<16x128xf32> -> vector<16x128xf32>
    %c0_29 = arith.constant 0 : index
    %c0_30 = arith.constant 0 : index
    %36 = vector.load %arg10[%c0_29, %c0_30] : memref<1x128xf32, #tpu.memory_space<vmem>>, vector<1x128xf32>
    %37 = vector.broadcast %36 : vector<1x128xf32> to vector<16x128xf32>
    %38 = arith.addf %35, %37 : vector<16x128xf32>
    %cst_31 = arith.constant 0.000000e+00 : f32
    %39 = vector.broadcast %cst_31 : f32 to vector<16x128xf32>
    %40 = arith.cmpf ogt, %38, %39 : vector<16x128xf32>
    %cst_32 = arith.constant 0.00999999977 : f32
    %41 = vector.broadcast %cst_32 : f32 to vector<16x128xf32>
    %42 = arith.mulf %41, %38 : vector<16x128xf32>
    %43 = arith.select %40, %38, %42 : vector<16x128xi1>, vector<16x128xf32>
    %44 = arith.truncf %43 : vector<16x128xf32> to vector<16x128xbf16>
    %c0_33 = arith.constant 0 : index
    %c0_34 = arith.constant 0 : index
    %45 = vector.load %arg11[%c0_33, %c0_34] : memref<128x128xbf16, #tpu.memory_space<vmem>>, vector<128x128xbf16>
    %cst_35 = arith.constant dense<0.000000e+00> : vector<16x128xf32>
    %46 = tpu.matmul %44, %45, %cst_35 {dimension_numbers = #tpu.dot_dimension_numbers<[1], [0], [0], [1], [0, 0, 1, 1], [], []>} : vector<16x128xbf16>, vector<128x128xbf16>, vector<16x128xf32> -> vector<16x128xf32>
    %c0_36 = arith.constant 0 : index
    %c0_37 = arith.constant 0 : index
    %47 = vector.load %arg12[%c0_36, %c0_37] : memref<1x128xf32, #tpu.memory_space<vmem>>, vector<1x128xf32>
    %48 = vector.broadcast %47 : vector<1x128xf32> to vector<16x128xf32>
    %49 = arith.addf %46, %48 : vector<16x128xf32>
    %cst_38 = arith.constant 0.000000e+00 : f32
    %50 = vector.broadcast %cst_38 : f32 to vector<16x128xf32>
    %51 = arith.cmpf ogt, %49, %50 : vector<16x128xf32>
    %cst_39 = arith.constant 0.00999999977 : f32
    %52 = vector.broadcast %cst_39 : f32 to vector<16x128xf32>
    %53 = arith.mulf %52, %49 : vector<16x128xf32>
    %54 = arith.select %51, %49, %53 : vector<16x128xi1>, vector<16x128xf32>
    %55 = arith.truncf %54 : vector<16x128xf32> to vector<16x128xbf16>
    %c0_40 = arith.constant 0 : index
    %c0_41 = arith.constant 0 : index
    %56 = vector.load %arg13[%c0_40, %c0_41] : memref<128x128xbf16, #tpu.memory_space<vmem>>, vector<128x128xbf16>
    %cst_42 = arith.constant dense<0.000000e+00> : vector<16x128xf32>
    %57 = tpu.matmul %55, %56, %cst_42 {dimension_numbers = #tpu.dot_dimension_numbers<[1], [0], [0], [1], [0, 0, 1, 1], [], []>} : vector<16x128xbf16>, vector<128x128xbf16>, vector<16x128xf32> -> vector<16x128xf32>
    %c0_43 = arith.constant 0 : index
    %c0_44 = arith.constant 0 : index
    %58 = vector.load %arg14[%c0_43, %c0_44] : memref<1x128xf32, #tpu.memory_space<vmem>>, vector<1x128xf32>
    %59 = vector.broadcast %58 : vector<1x128xf32> to vector<16x128xf32>
    %60 = arith.addf %57, %59 : vector<16x128xf32>
    %c0_45 = arith.constant 0 : index
    %c0_46 = arith.constant 0 : index
    %61 = vector.load %arg16[%c0_45, %c0_46] : memref<16x128xf32, #tpu.memory_space<vmem>>, vector<16x128xf32>
    tpu.vector_store %arg16[%c0_45, %c0_46], %60 {strides = array<i32>} : memref<16x128xf32, #tpu.memory_space<vmem>>, vector<16x128xf32>,
    return
  }
  func.func @transform_0(%arg0: i32) -> (i32, i32) {
    %c0_i32 = arith.constant 0 : i32
    %c0_i32_0 = arith.constant 0 : i32
    return %arg0, %c0_i32 : i32, i32
  }
  func.func @transform_1(%arg0: i32) -> (i32, i32) {
    %c0_i32 = arith.constant 0 : i32
    %c0_i32_0 = arith.constant 0 : i32
    %c0_i32_1 = arith.constant 0 : i32
    return %c0_i32, %c0_i32_0 : i32, i32
  }
  func.func @transform_2(%arg0: i32) -> (i32, i32) {
    %c0_i32 = arith.constant 0 : i32
    %c0_i32_0 = arith.constant 0 : i32
    %c0_i32_1 = arith.constant 0 : i32
    return %c0_i32, %c0_i32_0 : i32, i32
  }
  func.func @transform_3(%arg0: i32) -> (i32, i32) {
    %c0_i32 = arith.constant 0 : i32
    %c0_i32_0 = arith.constant 0 : i32
    %c0_i32_1 = arith.constant 0 : i32
    return %c0_i32, %c0_i32_0 : i32, i32
  }
  func.func @transform_4(%arg0: i32) -> (i32, i32) {
    %c0_i32 = arith.constant 0 : i32
    %c0_i32_0 = arith.constant 0 : i32
    %c0_i32_1 = arith.constant 0 : i32
    return %c0_i32, %c0_i32_0 : i32, i32
  }
  func.func @transform_5(%arg0: i32) -> (i32, i32) {
    %c0_i32 = arith.constant 0 : i32
    %c0_i32_0 = arith.constant 0 : i32
    %c0_i32_1 = arith.constant 0 : i32
    return %c0_i32, %c0_i32_0 : i32, i32
  }
  func.func @transform_6(%arg0: i32) -> (i32, i32) {
    %c0_i32 = arith.constant 0 : i32
    %c0_i32_0 = arith.constant 0 : i32
    %c0_i32_1 = arith.constant 0 : i32
    return %c0_i32, %c0_i32_0 : i32, i32
  }
  func.func @transform_7(%arg0: i32) -> (i32, i32) {
    %c0_i32 = arith.constant 0 : i32
    %c0_i32_0 = arith.constant 0 : i32
    %c0_i32_1 = arith.constant 0 : i32
    return %c0_i32, %c0_i32_0 : i32, i32
  }
  func.func @transform_8(%arg0: i32) -> (i32, i32) {
    %c0_i32 = arith.constant 0 : i32
    %c0_i32_0 = arith.constant 0 : i32
    %c0_i32_1 = arith.constant 0 : i32
    return %c0_i32, %c0_i32_0 : i32, i32
  }
  func.func @transform_9(%arg0: i32) -> (i32, i32) {
    %c0_i32 = arith.constant 0 : i32
    %c0_i32_0 = arith.constant 0 : i32
    %c0_i32_1 = arith.constant 0 : i32
    return %c0_i32, %c0_i32_0 : i32, i32
  }
  func.func @transform_10(%arg0: i32) -> (i32, i32) {
    %c0_i32 = arith.constant 0 : i32
    %c0_i32_0 = arith.constant 0 : i32
    %c0_i32_1 = arith.constant 0 : i32
    return %c0_i32, %c0_i32_0 : i32, i32
  }
  func.func @transform_11(%arg0: i32) -> (i32, i32) {
    %c0_i32 = arith.constant 0 : i32
    %c0_i32_0 = arith.constant 0 : i32
    %c0_i32_1 = arith.constant 0 : i32
    return %c0_i32, %c0_i32_0 : i32, i32
  }
  func.func @transform_12(%arg0: i32) -> (i32, i32) {
    %c0_i32 = arith.constant 0 : i32
    %c0_i32_0 = arith.constant 0 : i32
    %c0_i32_1 = arith.constant 0 : i32
    return %c0_i32, %c0_i32_0 : i32, i32
  }
  func.func @transform_13(%arg0: i32) -> (i32, i32) {
    %c0_i32 = arith.constant 0 : i32
    %c0_i32_0 = arith.constant 0 : i32
    %c0_i32_1 = arith.constant 0 : i32
    return %c0_i32, %c0_i32_0 : i32, i32
  }
  func.func @transform_14(%arg0: i32) -> (i32, i32) {
    %c0_i32 = arith.constant 0 : i32
    %c0_i32_0 = arith.constant 0 : i32
    return %arg0, %c0_i32 : i32, i32
  }
  func.func @transform_15(%arg0: i32) -> (i32, i32) {
    %c0_i32 = arith.constant 0 : i32
    %c0_i32_0 = arith.constant 0 : i32
    return %arg0, %c0_i32 : i32, i32
  }
  func.func @transform_16(%arg0: i32) -> (i32, i32) {
    %c0_i32 = arith.constant 0 : i32
    %c0_i32_0 = arith.constant 0 : i32
    return %arg0, %c0_i32 : i32, i32
  }
}

</mosaic_0001>

<bundles_post_ra>
// kernel: tpu_custom_call.1
= control target key start
LH: loop header
LB: loop body
LE: loop exit
PB: predicated region body
PF: predicated region fallthrough
CT: control target
= control target key end

     0   :  { %s1608_s0 = inlined_call_operand.hbm [shape: bf16[16,128], index: 0, kind: input, shape index: {}]   ;;  %s1609_s1 = inlined_call_operand.hbm [shape: bf16[128,128], index: 1, kind: input, shape index: {}]   ;;  %s1610_s2 = inlined_call_operand.vmem [shape: f32[1,128], index: 2, kind: input, shape index: {}]   ;;  %s1611_s3 = inlined_call_operand.hbm [shape: bf16[128,128], index: 3, kind: input, shape index: {}]   ;;  %s1612_s4 = inlined_call_operand.vmem [shape: f32[1,128], index: 4, kind: input, shape index: {}]   ;;  %s1613_s5 = inlined_call_operand.hbm [shape: bf16[128,128], index: 5, kind: input, shape index: {}]   ;;  %s1614_s6 = inlined_call_operand.vmem [shape: f32[1,128], index: 6, kind: input, shape index: {}]   ;;  %s1615_s7 = inlined_call_operand.hbm [shape: bf16[128,128], index: 7, kind: input, shape index: {}]   ;;  %s1616_s8 = inlined_call_operand.hbm [shape: bf16[128,128], index: 8, kind: input, shape index: {}]   ;;  %s1617_s9 = inlined_call_operand.vmem [shape: f32[1,128], index: 9, kind: input, shape index: {}]   ;;  %s1618_s10 = inlined_call_operand.hbm [shape: bf16[128,128], index: 10, kind: input, shape index: {}]   ;;  %s1619_s11 = inlined_call_operand.vmem [shape: f32[1,128], index: 11, kind: input, shape index: {}]   ;;  %s1620_s12 = inlined_call_operand.hbm [shape: bf16[128,128], index: 12, kind: input, shape index: {}]   ;;  %s1621_s13 = inlined_call_operand.vmem [shape: f32[1,128], index: 13, kind: input, shape index: {}]   ;;  %s1622_s14 = inlined_call_operand.hbm [shape: f32[16,128], index: 14, kind: output, shape index: {0}]   ;;  %s1623_s15 = inlined_call_operand.hbm [shape: f32[16,128], index: 15, kind: output, shape index: {1}]   ;;  %s1624_s16 = inlined_call_operand.hbm [shape: f32[16,128], index: 16, kind: output, shape index: {2}]  }
   0x1   :  { %1625 = sst [smem:[#allocation27_spill]] %s1608_s0 }
   0x2   :  { %22 = vsyncpa [#allocation3], 0 }
   0x3   :  { %23 = vsyncpa [#allocation6], 0 }
   0x4   :  { %24 = vsyncpa [#allocation9], 0 }
   0x5   :  { %25 = vsyncpa [#allocation12], 0 }
   0x6   :  { %26 = vsyncpa [#allocation15], 0 }
   0x7   :  { %27 = vsyncpa [#allocation4], 0 }
   0x8   :  { %28 = vsyncpa [#allocation18], 0  ;;  %s46_s23 = sshll.u32 %s1609_s1, 4  ;;  %s1433_s24 = smov [#allocation5]   ;;  %s47_s23 = int_to_ptr.hbm [resolvable:$true] %s46_s23 }
   0x9   :  { %s48_s25 = sshll.u32 %s1433_s24, 4  ;;  %s76_s28 = sshll.u32 %s1613_s5, 4  ;;  %s49_s25 = int_to_ptr.vmem [resolvable:$true] %s48_s25  ;;  %s77_s28 = int_to_ptr.hbm [resolvable:$true] %s76_s28 }
   0xa   :  { %s1434_s29 = smov 64   ;;  %s1435_s30 = smov 4  }
   0xb   :  { %54 = dma.hbm_to_vmem [thread:$0]  %s47_s23, 1024, %s49_s25, [#allocation6], %s1434_s29, %s1434_s29, %s1435_s30  }
   0xc   :  { %s1436_s0 = smov [#allocation8]   ;;  %s104_s1 = sshll.u32 %s1616_s8, 4  ;;  %s105_s1 = int_to_ptr.hbm [resolvable:$true] %s104_s1 }
   0xd   :  { %s78_s17 = sshll.u32 %s1436_s0, 4  ;;  %s1626_s21 = sld [smem:[#allocation27_spill]]  ;;  %s79_s17 = int_to_ptr.vmem [resolvable:$true] %s78_s17 }
   0xe   :  { %84 = dma.hbm_to_vmem [thread:$0]  %s77_s28, 1024, %s79_s17, [#allocation9], %s1434_s29, %s1434_s29, %s1435_s30  }
   0xf   :  { %s1437_s24 = smov [#allocation11]   ;;  %s1438_s23 = smov [#allocation2]  }
  0x10   :  { %s106_s26 = sshll.u32 %s1437_s24, 4  ;;  %s35_s8 = sshll.u32 %s1438_s23, 4  ;;  %s107_s26 = int_to_ptr.vmem [resolvable:$true] %s106_s26  ;;  %s36_s8 = int_to_ptr.vmem [resolvable:$true] %s35_s8 }
  0x11   :  { %112 = dma.hbm_to_vmem [thread:$0]  %s105_s1, 1024, %s107_s26, [#allocation12], %s1434_s29, %s1434_s29, %s1435_s30  }
  0x12   :  { %s61_s0 = sshll.u32 %s1611_s3, 4  ;;  %s91_s18 = sshll.u32 %s1615_s7, 4  ;;  %s62_s0 = int_to_ptr.hbm [resolvable:$true] %s61_s0  ;;  %s92_s18 = int_to_ptr.hbm [resolvable:$true] %s91_s18 }
  0x13   :  { %s33_s22 = sshll.u32 %s1626_s21, 4  ;;  %s1439_s19 = smov [#allocation7]   ;;  %s34_s22 = int_to_ptr.hbm [resolvable:$true] %s33_s22 }
  0x14   :  { %41 = dma.hbm_to_vmem [thread:$0]  %s34_s22, 128, %s36_s8, [#allocation3], %s1434_s29, %s1434_s29, %s1435_s30  }
  0x15   :  { %s63_s5 = sshll.u32 %s1439_s19, 4  ;;  %s1440_s1 = smov [#allocation10]   ;;  %s64_s5 = int_to_ptr.vmem [resolvable:$true] %s63_s5 }
  0x16   :  { %69 = dma.hbm_to_vmem [thread:$0]  %s62_s0, 1024, %s64_s5, [#allocation6], %s1434_s29, %s1434_s29, %s1435_s30  }
  0x17   :  { %s93_s3 = sshll.u32 %s1440_s1, 4  ;;  %s119_s24 = sshll.u32 %s1618_s10, 4  ;;  %s94_s3 = int_to_ptr.vmem [resolvable:$true] %s93_s3  ;;  %s120_s24 = int_to_ptr.hbm [resolvable:$true] %s119_s24 }
  0x18   :  { %99 = dma.hbm_to_vmem [thread:$0]  %s92_s18, 1024, %s94_s3, [#allocation9], %s1434_s29, %s1434_s29, %s1435_s30  }
  0x19   :  { %s134_s26 = sshll.u32 %s1620_s12, 4  ;;  %s1441_s23 = smov [#allocation13]   ;;  %s135_s26 = int_to_ptr.hbm [resolvable:$true] %s134_s26 }
  0x1a   :  { %s121_s8 = sshll.u32 %s1441_s23, 4  ;;  %s1442_s25 = smov [#allocation14]   ;;  %s122_s8 = int_to_ptr.vmem [resolvable:$true] %s121_s8 }
  0x1b   :  { %127 = dma.hbm_to_vmem [thread:$0]  %s120_s24, 1024, %s122_s8, [#allocation12], %s1434_s29, %s1434_s29, %s1435_s30  }
  0x1c   :  { %s136_s10 = sshll.u32 %s1442_s25, 4  ;;  %s137_s10 = int_to_ptr.vmem [resolvable:$true] %s136_s10 }
  0x1d   :  { %142 = dma.hbm_to_vmem [thread:$0]  %s135_s26, 1024, %s137_s10, [#allocation15], %s1434_s29, %s1434_s29, %s1435_s30  }
  0x1e   :  { %1419 = dma.done.wait [#allocation3], 128  }
  0x1f   :  { %1420 = vsyncadd [#allocation3], 4294967168 }
  0x20   :  { %1421 = dma.done.wait [#allocation6], 2048  }
  0x21   :  { %1422 = vsyncadd [#allocation6], 4294965248 }
  0x22   :  { %1423 = dma.done.wait [#allocation9], 2048  }
  0x23   :  { %1424 = vsyncadd [#allocation9], 4294965248 }
  0x24   :  { %1425 = dma.done.wait [#allocation12], 2048  }
  0x25   :  { %1426 = vsyncadd [#allocation12], 4294965248 }
  0x26   :  { %1427 = dma.done.wait [#allocation15], 1024  }
  0x27   :  { %1428 = vsyncadd [#allocation15], 4294966272  ;;  %v1085_v0 = vld [vmem:[#allocation5 + $0x38] sm:$0xff]  ;;  %v1084_v1 = vld [vmem:[#allocation5 + $0x30] sm:$0xff]  ;;  %s797_s19 = sshll.u32 %s1622_s14, 4  ;;  %s1443_s5 = smov [#allocation16]   ;;  %s798_s19 = int_to_ptr.hbm [resolvable:$true] %s797_s19 }
  0x28   :  { %253 = vmatpush.bf16.msra.mxu0 %v1085_v0  ;;  %v1093_v2 = vld [vmem:[#allocation7 + $0x38] sm:$0xff]  ;;  %v1092_v3 = vld [vmem:[#allocation7 + $0x30] sm:$0xff]  ;;  %v1083_v4 = vld [vmem:[#allocation5 + $0x28] sm:$0xff]  ;;  %s795_s1 = sshll.u32 %s1443_s5, 4  ;;  %s1445_s3 = smov 8   ;;  %s796_s1 = int_to_ptr.vmem [resolvable:$true] %s795_s1 }
  0x29   :  { %342 = vmatpush.bf16.msra.mxu1 %v1093_v2  ;;  %v1091_v5 = vld [vmem:[#allocation7 + $0x28] sm:$0xff]  ;;  %v1082_v6 = vld [vmem:[#allocation5 + $0x20] sm:$0xff]  ;;  %v1081_v8 = vld [vmem:[#allocation5 + $0x18] sm:$0xff]  ;;  %s1446_s24 = smov [#allocation17]   ;;  %s810_s14 = sshll.u32 %s1623_s15, 4  ;;  %s811_s14 = int_to_ptr.hbm [resolvable:$true] %s810_s14 }
  0x2a   :  { %v1090_v7 = vld [vmem:[#allocation7 + $0x20] sm:$0xff]  ;;  %v1080_v9 = vld [vmem:[#allocation5 + $0x10] sm:$0xff]  ;;  %v1079_v10 = vld [vmem:[#allocation5 + $0x8] sm:$0xff]  ;;  %s808_s7 = sshll.u32 %s1446_s24, 4  ;;  %s1447_s23 = smov [#allocation19]   ;;  %s809_s7 = int_to_ptr.vmem [resolvable:$true] %s808_s7 }
  0x2b   :  { %v1078_v11 = vld [vmem:[#allocation5] sm:$0xff]  ;;  %v1077_v12 = vld [vmem:[#allocation2] sm:$0xff]  ;;  %v1088_v14 = vld [vmem:[#allocation7 + $0x10] sm:$0xff]  ;;  %s821_s8 = sshll.u32 %s1447_s23, 4  ;;  %s823_s12 = sshll.u32 %s1624_s16, 4  ;;  %s822_s8 = int_to_ptr.vmem [resolvable:$true] %s821_s8  ;;  %s824_s12 = int_to_ptr.hbm [resolvable:$true] %s823_s12 }
  0x2c   :  { %254 = vmatpush.bf16.msra.mxu0 %v1084_v1  ;;  %v1089_v13 = vld [vmem:[#allocation7 + $0x18] sm:$0xff]  ;;  %v1087_v15 = vld [vmem:[#allocation7 + $0x8] sm:$0xff]  ;;  %v1086_v16 = vld [vmem:[#allocation7] sm:$0xff] }
  0x2d   :  { %343 = vmatpush.bf16.msra.mxu1 %v1092_v3  ;;  %v1101_v17 = vld [vmem:[#allocation8 + $0x38] sm:$0xff]  ;;  %v1100_v18 = vld [vmem:[#allocation8 + $0x30] sm:$0xff]  ;;  %v1099_v19 = vld [vmem:[#allocation8 + $0x28] sm:$0xff] }
  0x2e   :  { %431 = vmatpush.bf16.msra.mxu2 %v1101_v17  ;;  %v1098_v20 = vld [vmem:[#allocation8 + $0x20] sm:$0xff]  ;;  %v1149_v22 = vld [vmem:[%s1610_s2] ss:$0 sm:$0xff]  ;;  %v1096_v32 = vld [vmem:[#allocation8 + $0x10] sm:$0xff] }
  0x2f   :  { %v1097_v31 = vld [vmem:[#allocation8 + $0x18] sm:$0xff]  ;;  %v1095_v33 = vld [vmem:[#allocation8 + $0x8] sm:$0xff]  ;;  %v1094_v34 = vld [vmem:[#allocation8] sm:$0xff] }
  0x30   :  { %255 = vmatpush.bf16.msra.mxu0 %v1083_v4  ;;  %v1109_v35 = vld [vmem:[#allocation10 + $0x38] sm:$0xff]  ;;  %v1108_v36 = vld [vmem:[#allocation10 + $0x30] sm:$0xff]  ;;  %v1107_v37 = vld [vmem:[#allocation10 + $0x28] sm:$0xff] }
  0x31   :  { %344 = vmatpush.bf16.msra.mxu1 %v1091_v5  ;;  %512 = vmatpush.bf16.msra.mxu3 %v1109_v35  ;;  %v1106_v38 = vld [vmem:[#allocation10 + $0x20] sm:$0xff]  ;;  %v1105_v39 = vld [vmem:[#allocation10 + $0x18] sm:$0xff]  ;;  %v1104_v50 = vld [vmem:[#allocation10 + $0x10] sm:$0xff] }
  0x32   :  { %432 = vmatpush.bf16.msra.mxu2 %v1100_v18  ;;  %v1150_v41 = vld [vmem:[%s1612_s4] ss:$0 sm:$0xff]  ;;  %v1103_v51 = vld [vmem:[#allocation10 + $0x8] sm:$0xff]  ;;  %v1102_v52 = vld [vmem:[#allocation10] sm:$0xff] }
  0x33   :  { %v1117_v53 = vld [vmem:[#allocation11 + $0x38] sm:$0xff]  ;;  %v1116_v54 = vld [vmem:[#allocation11 + $0x30] sm:$0xff]  ;;  %v1115_v55 = vld [vmem:[#allocation11 + $0x28] sm:$0xff] }
  0x34   :  { %256 = vmatpush.bf16.msra.mxu0 %v1082_v6  ;;  %v1114_v56 = vld [vmem:[#allocation11 + $0x20] sm:$0xff]  ;;  %v1113_v57 = vld [vmem:[#allocation11 + $0x18] sm:$0xff]  ;;  %v1112_v0 = vld [vmem:[#allocation11 + $0x10] sm:$0xff] }
  0x35   :  { %345 = vmatpush.bf16.msra.mxu1 %v1090_v7  ;;  %513 = vmatpush.bf16.msra.mxu3 %v1108_v36  ;;  %v1151_v58 = vld [vmem:[%s1614_s6] ss:$0 sm:$0xff]  ;;  %v1111_v1 = vld [vmem:[#allocation11 + $0x8] sm:$0xff]  ;;  %v1110_v2 = vld [vmem:[#allocation11] sm:$0xff] }
  0x36   :  { %433 = vmatpush.bf16.msra.mxu2 %v1099_v19  ;;  %v1125_v3 = vld [vmem:[#allocation13 + $0x38] sm:$0xff]  ;;  %v1124_v4 = vld [vmem:[#allocation13 + $0x30] sm:$0xff]  ;;  %v1123_v5 = vld [vmem:[#allocation13 + $0x28] sm:$0xff] }
  0x37   :  { %v1122_v6 = vld [vmem:[#allocation13 + $0x20] sm:$0xff]  ;;  %v1152_v19 = vld [vmem:[%s1617_s9] ss:$0 sm:$0xff] }
  0x38   :  { %257 = vmatpush.bf16.msra.mxu0 %v1081_v8  ;;  %v1130_v17 = vld [vmem:[#allocation14 + $0x20] sm:$0xff] }
  0x39   :  { %346 = vmatpush.bf16.msra.mxu1 %v1089_v13  ;;  %514 = vmatpush.bf16.msra.mxu3 %v1107_v37  ;;  %v1118_v13 = vld [vmem:[#allocation13] sm:$0xff] }
  0x3a   :  { %434 = vmatpush.bf16.msra.mxu2 %v1098_v20 }
  0x3c   :  { %258 = vmatpush.bf16.msra.mxu0 %v1080_v9 }
  0x3d   :  { %347 = vmatpush.bf16.msra.mxu1 %v1088_v14  ;;  %515 = vmatpush.bf16.msra.mxu3 %v1106_v38  ;;  %v1133_v14 = vld [vmem:[#allocation14 + $0x38] sm:$0xff] }
  0x3e   :  { %435 = vmatpush.bf16.msra.mxu2 %v1097_v31  ;;  %v1126_v31 = vld [vmem:[#allocation14] sm:$0xff] }
  0x40   :  { %259 = vmatpush.bf16.msra.mxu0 %v1079_v10  ;;  %v1121_v10 = vld [vmem:[#allocation13 + $0x18] sm:$0xff] }
  0x41   :  { %348 = vmatpush.bf16.msra.mxu1 %v1087_v15  ;;  %516 = vmatpush.bf16.msra.mxu3 %v1105_v39  ;;  %v1132_v15 = vld [vmem:[#allocation14 + $0x30] sm:$0xff] }
  0x42   :  { %436 = vmatpush.bf16.msra.mxu2 %v1096_v32 }
  0x44   :  { %260 = vmatpush.bf16.msra.mxu0 %v1078_v11  ;;  %v1120_v11 = vld [vmem:[#allocation13 + $0x10] sm:$0xff] }
  0x45   :  { %349 = vmatpush.bf16.msra.mxu1 %v1086_v16  ;;  %517 = vmatpush.bf16.msra.mxu3 %v1104_v50  ;;  %v1131_v16 = vld [vmem:[#allocation14 + $0x28] sm:$0xff] }
  0x46   :  { %437 = vmatpush.bf16.msra.mxu2 %v1095_v33  ;;  %v1153_v33 = vld [vmem:[%s1619_s11] ss:$0 sm:$0xff]  ;;  %s1444_s11 = smov 128  }
  0x47   :  { %261 = vmatmul.bf16.vlgmr.msra.gmra.mxu0 %v1077_v12  ;;  %v1119_v12 = vld [vmem:[#allocation13 + $0x8] sm:$0xff] }
  0x48   :  { %597 = vmatpush.bf16.msrb.mxu0 %v1117_v53 }
  0x49   :  { %518 = vmatpush.bf16.msra.mxu3 %v1103_v51  ;;  %686 = vmatpush.bf16.msrb.mxu1 %v1125_v3 }
  0x4a   :  { %438 = vmatpush.bf16.msra.mxu2 %v1094_v34 }
  0x4c   :  { %598 = vmatpush.bf16.msrb.mxu0 %v1116_v54 }
  0x4d   :  { %519 = vmatpush.bf16.msra.mxu3 %v1102_v52  ;;  %687 = vmatpush.bf16.msrb.mxu1 %v1124_v4 }
  0x4e   :  { %775 = vmatpush.bf16.msrb.mxu2 %v1133_v14 }
  0x50   :  { %599 = vmatpush.bf16.msrb.mxu0 %v1115_v55 }
  0x51   :  { %688 = vmatpush.bf16.msrb.mxu1 %v1123_v5 }
  0x52   :  { %776 = vmatpush.bf16.msrb.mxu2 %v1132_v15 }
  0x54   :  { %600 = vmatpush.bf16.msrb.mxu0 %v1114_v56 }
  0x55   :  { %689 = vmatpush.bf16.msrb.mxu1 %v1122_v6 }
  0x56   :  { %777 = vmatpush.bf16.msrb.mxu2 %v1131_v16 }
  0x58   :  { %601 = vmatpush.bf16.msrb.mxu0 %v1113_v57 }
  0x59   :  { %690 = vmatpush.bf16.msrb.mxu1 %v1121_v10 }
  0x5a   :  { %778 = vmatpush.bf16.msrb.mxu2 %v1130_v17 }
  0x5c   :  { %602 = vmatpush.bf16.msrb.mxu0 %v1112_v0 }
  0x5d   :  { %691 = vmatpush.bf16.msrb.mxu1 %v1120_v11 }
  0x60   :  { %603 = vmatpush.bf16.msrb.mxu0 %v1111_v1 }
  0x61   :  { %692 = vmatpush.bf16.msrb.mxu1 %v1119_v12 }
  0x64   :  { %604 = vmatpush.bf16.msrb.mxu0 %v1110_v2 }
  0x65   :  { %693 = vmatpush.bf16.msrb.mxu1 %v1118_v13 }
  0xc4   :  { %v262_v21 = vpop.f32.mrf.mxu0 }
  0xc5   :  { %v263_v23 = vadd.f32 %v1149_v22, %v262_v21 }
  0xc7   :  { %v269_v25 = vmul.f32 0.01, %v263_v23  ;;  %vm267_vm0 = vcmp.gt.f32.partialorder %v263_v23, 0.0 }
  0xc9   :  { %v271_v28 = vsel %vm267_vm0, %v263_v23, %v269_v25 }
  0xcc   :  { %v264_v24 = vpop.f32.mrf.mxu0 }
  0xcd   :  { %v265_v26 = vadd.f32 %v1149_v22, %v264_v24 }
  0xcf   :  { %v270_v27 = vmul.f32 0.01, %v265_v26  ;;  %vm268_vm1 = vcmp.gt.f32.partialorder %v265_v26, 0.0 }
  0xd1   :  { %v272_v29 = vsel %vm268_vm1, %v265_v26, %v270_v27 }
  0xd2   :  { %v273_v30 = vpack.c.bf16 %v272_v29, %v271_v28  ;;  %v1129_v28 = vld [vmem:[#allocation14 + $0x18] sm:$0xff]  ;;  %v1128_v29 = vld [vmem:[#allocation14 + $0x10] sm:$0xff] }
  0xd3   :  { %779 = vmatpush.bf16.msrb.mxu2 %v1129_v28 }
  0xd4   :  { %350 = vmatmul.bf16.vlgmr.msra.gmra.mxu1 %v273_v30  ;;  %v1127_v30 = vld [vmem:[#allocation14 + $0x8] sm:$0xff] }
  0xd7   :  { %780 = vmatpush.bf16.msrb.mxu2 %v1128_v29 }
  0xdb   :  { %781 = vmatpush.bf16.msrb.mxu2 %v1127_v30 }
  0xdf   :  { %782 = vmatpush.bf16.msrb.mxu2 %v1126_v31 }
 0x151   :  { %v351_v40 = vpop.f32.mrf.mxu1 }
 0x152   :  { %v352_v42 = vadd.f32 %v1150_v41, %v351_v40 }
 0x154   :  { %v358_v44 = vmul.f32 0.01, %v352_v42  ;;  %vm356_vm2 = vcmp.gt.f32.partialorder %v352_v42, 0.0 }
 0x156   :  { %v360_v47 = vsel %vm356_vm2, %v352_v42, %v358_v44  ;;  %v1154_v42 = vld [vmem:[%s1621_s13] ss:$0 sm:$0xff] }
 0x159   :  { %v353_v43 = vpop.f32.mrf.mxu1 }
 0x15a   :  { %v354_v45 = vadd.f32 %v1150_v41, %v353_v43 }
 0x15c   :  { %v359_v46 = vmul.f32 0.01, %v354_v45  ;;  %vm357_vm3 = vcmp.gt.f32.partialorder %v354_v45, 0.0 }
 0x15e   :  { %v361_v48 = vsel %vm357_vm3, %v354_v45, %v359_v46 }
 0x15f   :  { %v362_v49 = vpack.c.bf16 %v361_v48, %v360_v47 }
 0x161   :  { %439 = vmatmul.bf16.vlgmr.msra.gmra.mxu2 %v362_v49 }
 0x1e4   :  { %v440_v59 = vpop.f32.mrf.mxu2 }
 0x1e5   :  { %v441_v60 = vadd.f32 %v1151_v58, %v440_v59 }
 0x1e7   :  { %445 = vst [vmem:[#allocation16] sm:$0xff] %v441_v60 }
 0x1ec   :  { %v442_v61 = vpop.f32.mrf.mxu2 }
 0x1ed   :  { %v443_v62 = vadd.f32 %v1151_v58, %v442_v61 }
 0x1ef   :  { %446 = vst [vmem:[#allocation16 + $0x8] sm:$0xff] %v443_v62  ;;  %v447_v63 = vpack.c.bf16 %v443_v62, %v441_v60 }
 0x1f0   :  { %803 = dma.vmem_to_hbm [thread:$0]  %s796_s1, 256, %s798_s19, [#allocation4], %s1444_s11, %s1444_s11, %s1445_s3  }
 0x1f1   :  { %520 = vmatmul.bf16.vlgmr.msra.gmra.mxu3 %v447_v63 }
 0x274   :  { %v521_v7 = vpop.f32.mrf.mxu3 }
 0x275   :  { %526 = vst [vmem:[#allocation19] sm:$0xff] %v521_v7 }
 0x27c   :  { %v523_v8 = vpop.f32.mrf.mxu3 }
 0x27d   :  { %527 = vst [vmem:[#allocation19 + $0x8] sm:$0xff] %v523_v8  ;;  %v528_v9 = vpack.c.bf16 %v523_v8, %v521_v7 }
 0x27f   :  { %605 = vmatmul.bf16.vlgmr.msrb.gmra.mxu0 %v528_v9 }
 0x2fc   :  { %v606_v18 = vpop.f32.mrf.mxu0 }
 0x2fd   :  { %v607_v20 = vadd.f32 %v1152_v19, %v606_v18 }
 0x2ff   :  { %v613_v22 = vmul.f32 0.01, %v607_v20  ;;  %vm611_vm4 = vcmp.gt.f32.partialorder %v607_v20, 0.0 }
 0x301   :  { %v615_v25 = vsel %vm611_vm4, %v607_v20, %v613_v22 }
 0x304   :  { %v608_v21 = vpop.f32.mrf.mxu0 }
 0x305   :  { %v609_v23 = vadd.f32 %v1152_v19, %v608_v21 }
 0x307   :  { %vm612_vm5 = vcmp.gt.f32.partialorder %v609_v23, 0.0  ;;  %v614_v24 = vmul.f32 0.01, %v609_v23 }
 0x309   :  { %v616_v26 = vsel %vm612_vm5, %v609_v23, %v614_v24 }
 0x30a   :  { %v617_v27 = vpack.c.bf16 %v616_v26, %v615_v25 }
 0x30c   :  { %694 = vmatmul.bf16.vlgmr.msrb.gmra.mxu1 %v617_v27 }
 0x389   :  { %v695_v32 = vpop.f32.mrf.mxu1 }
 0x38a   :  { %v696_v34 = vadd.f32 %v1153_v33, %v695_v32 }
 0x38c   :  { %v702_v36 = vmul.f32 0.01, %v696_v34  ;;  %vm700_vm6 = vcmp.gt.f32.partialorder %v696_v34, 0.0 }
 0x38e   :  { %v704_v39 = vsel %vm700_vm6, %v696_v34, %v702_v36 }
 0x391   :  { %v697_v35 = vpop.f32.mrf.mxu1 }
 0x392   :  { %v698_v37 = vadd.f32 %v1153_v33, %v697_v35 }
 0x394   :  { %vm701_vm7 = vcmp.gt.f32.partialorder %v698_v37, 0.0  ;;  %v703_v38 = vmul.f32 0.01, %v698_v37 }
 0x396   :  { %v705_v40 = vsel %vm701_vm7, %v698_v37, %v703_v38 }
 0x397   :  { %v706_v41 = vpack.c.bf16 %v705_v40, %v704_v39 }
 0x399   :  { %783 = vmatmul.bf16.vlgmr.msrb.gmra.mxu2 %v706_v41 }
 0x41c   :  { %v784_v43 = vpop.f32.mrf.mxu2 }
 0x41d   :  { %v785_v44 = vadd.f32 %v1154_v42, %v784_v43 }
 0x41f   :  { %789 = vst [vmem:[#allocation17] sm:$0xff] %v785_v44 }
 0x424   :  { %v786_v45 = vpop.f32.mrf.mxu2 }
 0x425   :  { %v787_v46 = vadd.f32 %v1154_v42, %v786_v45 }
 0x427   :  { %790 = vst [vmem:[#allocation17 + $0x8] sm:$0xff] %v787_v46 }
 0x428   :  { %816 = dma.vmem_to_hbm [thread:$0]  %s809_s7, 256, %s811_s14, [#allocation18], %s1444_s11, %s1444_s11, %s1445_s3  }
 0x429   :  { %829 = dma.vmem_to_hbm [thread:$0]  %s822_s8, 256, %s824_s12, [#allocation18], %s1444_s11, %s1444_s11, %s1445_s3  }
 0x42a   :  { %1429 = dma.done.wait [#allocation4], 256  }
 0x42b   :  { %1430 = vsyncadd [#allocation4], 4294967040 }
 0x42c   :  { %1431 = dma.done.wait [#allocation18], 512  }
 0x42d   :  { %1432 = vsyncadd [#allocation18], 4294966784 }
 0x42e   :  { %842 = vsyncpa [#allocation3], 1 }
 0x42f   :  { %843 = vsyncpa [#allocation6], 1 }
 0x430   :  { %844 = vsyncpa [#allocation9], 1 }
 0x431   :  { %845 = vsyncpa [#allocation12], 1 }
 0x432   :  { %846 = vsyncpa [#allocation15], 1 }
 0x433   :  { %847 = vsyncpa [#allocation4], 1 }
 0x434   :  { %848 = vsyncpa [#allocation18], 1 }

</bundles_post_ra>
